<compile_context>
chip_gen: v7x
topology: tpu7x:2x2x1
jax: 0.10.0
libtpu: 0.0.40
codegen_flags: <defaults>
</compile_context>

<pallas_src>
import math

import jax
import jax.numpy as jnp
from jax import lax
from jax.experimental import pallas as pl
from jax.experimental.pallas import tpu as pltpu

PARAM_DTYPE = jnp.bfloat16   # module dtype is configurable (fp16 in trt-llm); bf16 on TPU

_VMEM_BUDGET = 48 * 1024 * 1024   # conservative vs. v7x's 64 MiB physical VMEM


def _round_up(x, m):
    return (x + m - 1) // m * m


def _patch_embed_kernel(x_ref, w_ref, b_ref, o_ref):
    """x: (TM, Kp); w: (Kp, Np); b: (1, Np); o: (TM, Np).  y = x @ w + b."""
    acc = jnp.dot(x_ref[...], w_ref[...], preferred_element_type=jnp.float32)
    acc = acc + b_ref[...].astype(jnp.float32)
    o_ref[...] = acc.astype(o_ref.dtype)


def _vmem_bytes(tm, k_pad, n_pad, itemsize=2):
    # double-buffered x and out tiles + (conservatively counted as
    # double-buffered) VMEM-resident weight / bias blocks
    return itemsize * (2 * tm * k_pad + 2 * tm * n_pad + 2 * k_pad * n_pad + 2 * n_pad)


def patch_embed_3d_forward(x, weight, bias, patch_size, flatten=True):
    """Replicates PatchEmbed3D.forward(x) with norm_layer=None.

    x      : (B, C, D, H, W) float array.
    weight : (E, C, pt, ph, pw) Conv3d weight.
    bias   : (E,) Conv3d bias.
    Returns (B, D'*H'*W', E) if flatten else (B, E, D', H', W'), dtype PARAM_DTYPE.
    """
    pt, ph, pw = patch_size
    B, C, D, H, W = x.shape
    E = weight.shape[0]

    # --- pad spatial dims to multiples of the patch size (zero pad, as torch) ---
    pad_d = (-D) % pt
    pad_h = (-H) % ph
    pad_w = (-W) % pw
    if pad_d or pad_h or pad_w:
        x = jnp.pad(x, ((0, 0), (0, 0), (0, pad_d), (0, pad_h), (0, pad_w)))
    Dp, Hp, Wp = D + pad_d, H + pad_h, W + pad_w
    nd, nh, nw = Dp // pt, Hp // ph, Wp // pw
    N = nd * nh * nw
    K = C * pt * ph * pw

    # --- cast to bf16 BEFORE the transpose so the patchify pass moves 2-byte
    #     elements instead of 4-byte ones ---
    x = x.astype(PARAM_DTYPE)

    # --- patchify (layout plumbing only): rows ordered (b, d', h', w'),
    #     patch elements ordered (c, kt, kh, kw) to match Conv3d weight layout ---
    xp = x.reshape(B, C, nd, pt, nh, ph, nw, pw)
    xp = xp.transpose(0, 2, 4, 6, 1, 3, 5, 7)          # (B, nd, nh, nw, C, pt, ph, pw)
    xp = xp.reshape(B * N, K)

    # --- flatten conv weight to (K, E) so the kernel computes x @ W + b ---
    wk = weight.reshape(E, K).T.astype(PARAM_DTYPE)
    bk = bias.reshape(1, E).astype(PARAM_DTYPE)

    rows = B * N

    # Contraction dim: pad K up to a multiple of 128 (zero columns in xp, zero
    # rows in W -> results unchanged, but dense 128-lane loads / MXU passes).
    k_pad = _round_up(K, 128)
    if k_pad != K:
        xp = jnp.pad(xp, ((0, 0), (0, k_pad - K)))
        wk = jnp.pad(wk, ((0, k_pad - K), (0, 0)))

    # Lane-dense output: pad embed dim up to a multiple of 128 (padded columns
    # are zero weights / zero bias and are sliced off below if needed).
    n_pad = _round_up(E, 128)
    if n_pad != E:
        wk = jnp.pad(wk, ((0, 0), (0, n_pad - E)))
        bk = jnp.pad(bk, ((0, 0), (0, n_pad - E)))

    # Row tile: as large as possible (HBM-bound GEMM, tiny K), multiple of 16
    # for bf16 sublane packing, capped at 1024 and shrunk only if the VMEM
    # estimate would blow the budget.
    tm = min(1024, _round_up(rows, 16))
    while tm > 16 and _vmem_bytes(tm, k_pad, n_pad) > _VMEM_BUDGET:
        tm = max(16, _round_up(tm // 2, 16))

    rows_pad = _round_up(rows, tm)
    if rows_pad != rows:
        xp = jnp.pad(xp, ((0, rows_pad - rows), (0, 0)))

    grid = (rows_pad // tm,)   # 1-D grid: weight/bias blocks are VMEM-resident

    vmem_limit = int(min(max(_vmem_bytes(tm, k_pad, n_pad) + (4 << 20), 32 << 20),
                         62 << 20))

    cost = pl.CostEstimate(
        flops=2 * rows_pad * k_pad * n_pad,
        transcendentals=0,
        bytes_accessed=2 * (rows_pad * k_pad + k_pad * n_pad + n_pad
                            + rows_pad * n_pad))

    out = pl.pallas_call(
        _patch_embed_kernel,
        out_shape=jax.ShapeDtypeStruct((rows_pad, n_pad), PARAM_DTYPE),
        grid=grid,
        in_specs=[
            pl.BlockSpec((tm, k_pad), lambda i: (i, 0)),
            pl.BlockSpec((k_pad, n_pad), lambda i: (0, 0)),   # resident in VMEM
            pl.BlockSpec((1, n_pad), lambda i: (0, 0)),       # resident in VMEM
        ],
        out_specs=pl.BlockSpec((tm, n_pad), lambda i: (i, 0)),
        compiler_params=pltpu.CompilerParams(
            dimension_semantics=("parallel",),
            vmem_limit_bytes=vmem_limit),
        cost_estimate=cost,
    )(xp, wk, bk)

    # Slice off padding only when padding actually occurred (avoids an extra
    # HBM pass in the aligned common case, e.g. embed_dim=1152 and aligned rows).
    if rows_pad != rows or n_pad != E:
        out = out[:rows, :E]

    if flatten:
        return out.reshape(B, N, E)                    # (B, D'*H'*W', E)
    return out.reshape(B, nd, nh, nw, E).transpose(0, 4, 1, 2, 3)


def init_params(key, in_chans, embed_dim, patch_size):
    kw, kb = jax.random.split(key)
    K = in_chans * patch_size[0] * patch_size[1] * patch_size[2]
    weight = (jax.random.normal(kw, (embed_dim, in_chans) + tuple(patch_size),
                                jnp.float32) / math.sqrt(K)).astype(PARAM_DTYPE)
    bias = (jax.random.normal(kb, (embed_dim,), jnp.float32) * 0.02).astype(PARAM_DTYPE)
    return weight, bias


def reference_forward(x, weight, bias, patch_size, flatten=True):
    """Pure-JAX reference (strided Conv3d + flatten/transpose), same input precision."""
    pt, ph, pw = patch_size
    B, C, D, H, W = x.shape
    pad_d = (-D) % pt
    pad_h = (-H) % ph
    pad_w = (-W) % pw
    if pad_d or pad_h or pad_w:
        x = jnp.pad(x, ((0, 0), (0, 0), (0, pad_d), (0, pad_h), (0, pad_w)))
    xf = x.astype(PARAM_DTYPE).astype(jnp.float32)
    wf = weight.astype(PARAM_DTYPE).astype(jnp.float32)
    y = lax.conv_general_dilated(
        xf, wf, window_strides=(pt, ph, pw), padding="VALID",
        dimension_numbers=("NCDHW", "OIDHW", "NCDHW"),
        precision=lax.Precision.HIGHEST)
    y = y + bias.astype(jnp.float32).reshape(1, -1, 1, 1, 1)
    if flatten:
        Bo, Eo, d, h, w = y.shape
        y = y.reshape(Bo, Eo, d * h * w).transpose(0, 2, 1)
    return y


if __name__ == "__main__":
    key = jax.random.PRNGKey(0)

    # Small shapes consistent with the module (H=30 exercises the pad branch).
    B, C, D, H, W = 2, 4, 4, 30, 32
    patch_size = (2, 4, 4)
    embed_dim = 96

    kp, kx = jax.random.split(key)
    weight, bias = init_params(kp, C, embed_dim, patch_size)
    x = jax.random.normal(kx, (B, C, D, H, W), jnp.float32)

    out = patch_embed_3d_forward(x, weight, bias, patch_size, flatten=True)
    out = jax.block_until_ready(out)

    ref = reference_forward(x, weight, bias, patch_size, flatten=True)

    nd = (D + (-D) % patch_size[0]) // patch_size[0]
    nh = (H + (-H) % patch_size[1]) // patch_size[1]
    nw = (W + (-W) % patch_size[2]) // patch_size[2]
    assert out.shape == (B, nd * nh * nw, embed_dim), out.shape
    assert out.shape == ref.shape, (out.shape, ref.shape)
    assert jnp.allclose(out.astype(jnp.float32), ref.astype(jnp.float32),
                        atol=2e-2, rtol=2e-2), "mismatch vs reference"

    print("KERNEL_OK")
</pallas_src>

<mosaic_0001>
module attributes {stable_mosaic.version = 11 : i64} {
  func.func @_patch_embed_kernel(%arg0: i32, %arg1: memref<256x128xbf16, #tpu.memory_space<vmem>>, %arg2: memref<128x128xbf16, #tpu.memory_space<vmem>>, %arg3: memref<1x128xbf16, #tpu.memory_space<vmem>>, %arg4: memref<256x128xbf16, #tpu.memory_space<vmem>>) attributes {dimension_semantics = [#tpu.dimension_semantics<parallel>], iteration_bounds = array<i64: 1>, scalar_prefetch = 0 : i64, scratch_operands = 0 : i64, tpu.core_type = #tpu.core_type<tc>, window_params = [{transform_indices = @transform_0, window_bounds = array<i64: 256, 128>}, {pipeline_mode = #tpu.pipeline_mode<synchronous>, transform_indices = @transform_1, window_bounds = array<i64: 128, 128>}, {pipeline_mode = #tpu.pipeline_mode<synchronous>, transform_indices = @transform_2, window_bounds = array<i64: 1, 128>}, {transform_indices = @transform_3, window_bounds = array<i64: 256, 128>}]} {
    %c0 = arith.constant 0 : index
    %c0_0 = arith.constant 0 : index
    %0 = vector.load %arg1[%c0, %c0_0] : memref<256x128xbf16, #tpu.memory_space<vmem>>, vector<256x128xbf16>
    %c0_1 = arith.constant 0 : index
    %c0_2 = arith.constant 0 : index
    %1 = vector.load %arg2[%c0_1, %c0_2] : memref<128x128xbf16, #tpu.memory_space<vmem>>, vector<128x128xbf16>
    %cst = arith.constant dense<0.000000e+00> : vector<256x128xf32>
    %2 = tpu.matmul %0, %1, %cst {dimension_numbers = #tpu.dot_dimension_numbers<[1], [0], [0], [1], [0, 0, 1, 1], [], []>} : vector<256x128xbf16>, vector<128x128xbf16>, vector<256x128xf32> -> vector<256x128xf32>
    %c0_3 = arith.constant 0 : index
    %c0_4 = arith.constant 0 : index
    %3 = vector.load %arg3[%c0_3, %c0_4] : memref<1x128xbf16, #tpu.memory_space<vmem>>, vector<1x128xbf16>
    %4 = arith.extf %3 : vector<1x128xbf16> to vector<1x128xf32>
    %5 = vector.broadcast %4 : vector<1x128xf32> to vector<256x128xf32>
    %6 = arith.addf %2, %5 : vector<256x128xf32>
    %7 = arith.truncf %6 : vector<256x128xf32> to vector<256x128xbf16>
    %c0_5 = arith.constant 0 : index
    %c0_6 = arith.constant 0 : index
    %8 = vector.load %arg4[%c0_5, %c0_6] : memref<256x128xbf16, #tpu.memory_space<vmem>>, vector<256x128xbf16>
    tpu.vector_store %arg4[%c0_5, %c0_6], %7 {strides = array<i32>} : memref<256x128xbf16, #tpu.memory_space<vmem>>, vector<256x128xbf16>,
    return
  }
  func.func @transform_0(%arg0: i32) -> (i32, i32) {
    %c0_i32 = arith.constant 0 : i32
    %c0_i32_0 = arith.constant 0 : i32
    return %arg0, %c0_i32 : i32, i32
  }
  func.func @transform_1(%arg0: i32) -> (i32, i32) {
    %c0_i32 = arith.constant 0 : i32
    %c0_i32_0 = arith.constant 0 : i32
    %c0_i32_1 = arith.constant 0 : i32
    return %c0_i32, %c0_i32_0 : i32, i32
  }
  func.func @transform_2(%arg0: i32) -> (i32, i32) {
    %c0_i32 = arith.constant 0 : i32
    %c0_i32_0 = arith.constant 0 : i32
    %c0_i32_1 = arith.constant 0 : i32
    return %c0_i32, %c0_i32_0 : i32, i32
  }
  func.func @transform_3(%arg0: i32) -> (i32, i32) {
    %c0_i32 = arith.constant 0 : i32
    %c0_i32_0 = arith.constant 0 : i32
    return %arg0, %c0_i32 : i32, i32
  }
}

</mosaic_0001>

<bundles_post_ra>
// kernel: tpu_custom_call.1
= control target key start
LH: loop header
LB: loop body
LE: loop exit
PB: predicated region body
PF: predicated region fallthrough
CT: control target
= control target key end

     0   :  { %8 = vsyncpa [#allocation3], 0  ;;  %s1060_s0 = inlined_call_operand.hbm [shape: bf16[256,128], index: 0, kind: input, shape index: {}]   ;;  %s1061_s1 = inlined_call_operand.hbm [shape: bf16[128,128], index: 1, kind: input, shape index: {}]   ;;  %s1062_s2 = inlined_call_operand.vmem [shape: bf16[1,128], index: 2, kind: input, shape index: {}]   ;;  %s1063_s3 = inlined_call_operand.hbm [shape: bf16[256,128], index: 3, kind: output, shape index: {}]  }
   0x1   :  { %9 = vsyncpa [#allocation6], 0 }
   0x2   :  { %10 = vsyncpa [#allocation4], 0  ;;  %s953_s12 = smov [#allocation2]   ;;  %s881_s16 = scalar_lea.hbm %s1060_s0, 2048 }
   0x3   :  { %s16_s13 = sshll.u32 %s953_s12, 4  ;;  %p882_p0 = scmp.ne.s32.totalorder %s1060_s0, %s881_s16  ;;  %s17_s13 = int_to_ptr.vmem [resolvable:$true] %s16_s13 }
   0x4   :  { %p885_p1 = scmp.lt.u32.totalorder %s881_s16, %s1060_s0 }
   0x6   :  { %p887_p2 = pnand %p885_p1, %p882_p0 }
   0x8   :  { %890 = shalt.err (!%p887_p2)
}
   0x9   :  { %s891_s21 = scalar_lea.vmem %s17_s13, 2048  ;;  %p896_p4 = scmp.lt.s32.totalorder %s17_s13, %s17_s13 }
   0xa   :  { %p892_p3 = scmp.ne.s32.totalorder %s17_s13, %s891_s21  ;;  %p897_p5 = scmp.lt.s32.totalorder %s891_s21, %s891_s21 }
   0xc   :  { %p898_p6 = por %p897_p5, %p896_p4 }
   0xe   :  { %p899_p7 = pnand %p898_p6, %p892_p3 }
  0x10   :  { %902 = shalt.err (!%p899_p7)
}
  0x11   :  { %s954_s22 = smov 64   ;;  %s955_s23 = smov 4  }
  0x12   :  { %22 = dma.hbm_to_vmem [thread:$0]  %s1060_s0, 2048, %s17_s13, [#allocation3], %s954_s22, %s954_s22, %s955_s23  }
  0x13   :  { %s956_s26 = smov [#allocation5]   ;;  %s903_s30 = scalar_lea.hbm %s1061_s1, 1024 }
  0x14   :  { %s28_s27 = sshll.u32 %s956_s26, 4  ;;  %p904_p8 = scmp.ne.s32.totalorder %s1061_s1, %s903_s30  ;;  %s29_s27 = int_to_ptr.vmem [resolvable:$true] %s28_s27 }
  0x15   :  { %p907_p9 = scmp.lt.u32.totalorder %s903_s30, %s1061_s1 }
  0x17   :  { %p909_p10 = pnand %p907_p9, %p904_p8 }
  0x19   :  { %912 = shalt.err (!%p909_p10)
}
  0x1a   :  { %s913_s8 = scalar_lea.vmem %s29_s27, 1024  ;;  %p918_p12 = scmp.lt.s32.totalorder %s29_s27, %s29_s27 }
  0x1b   :  { %p914_p11 = scmp.ne.s32.totalorder %s29_s27, %s913_s8  ;;  %p919_p13 = scmp.lt.s32.totalorder %s913_s8, %s913_s8 }
  0x1d   :  { %p920_p0 = por %p919_p13, %p918_p12 }
  0x1f   :  { %p921_p1 = pnand %p920_p0, %p914_p11 }
  0x21   :  { %924 = shalt.err (!%p921_p1)
}
  0x22   :  { %34 = dma.hbm_to_vmem [thread:$0]  %s1061_s1, 1024, %s29_s27, [#allocation6], %s954_s22, %s954_s22, %s955_s23  }
  0x23   :  { %947 = dma.done.wait [#allocation3], 2048  }
  0x24   :  { %948 = vsyncadd [#allocation3], 4294965248 }
  0x25   :  { %949 = dma.done.wait [#allocation6], 1024  }
  0x26   :  { %950 = vsyncadd [#allocation6], 4294966272  ;;  %v857_v0 = vld [vmem:[#allocation5] sm:$0xff]   ;;  %v858_v1 = vld [vmem:[#allocation5 + $0x8] sm:$0xff]   ;;  %v94_v24 = vlaneseq }
  0x27   :  { %788 = vmatprep.subr.bf16.mxu0 %v857_v0  ;;  %836 = vmatprep.subr.bf16.mxu1 %v857_v0  ;;  %v859_v2 = vld [vmem:[#allocation5 + $0x10] sm:$0xff]   ;;  %v860_v3 = vld [vmem:[#allocation5 + $0x18] sm:$0xff]   ;;  %v865_v4 = vld [vmem:[#allocation2] sm:$0xff]  }
  0x28   :  { %789 = vmatpush3.bf16.msra.mxu0 %v857_v0  ;;  %844 = vmatpush3.bf16.msra.mxu1 %v857_v0  ;;  %v866_v5 = vld [vmem:[#allocation2 + $0x40] sm:$0xff]   ;;  %v862_v7 = vld [vmem:[#allocation5 + $0x28] sm:$0xff]   ;;  %v863_v8 = vld [vmem:[#allocation5 + $0x30] sm:$0xff]   ;;  %v95_v25 = vshrl.u32 %v94_v24, 7 }
  0x29   :  { %790 = vmatprep.subr.bf16.mxu0 %v858_v1  ;;  %837 = vmatprep.subr.bf16.mxu1 %v858_v1  ;;  %v861_v6 = vld [vmem:[#allocation5 + $0x20] sm:$0xff]   ;;  %v864_v9 = vld [vmem:[#allocation5 + $0x38] sm:$0xff]   ;;  %v867_v10 = vld [vmem:[#allocation2 + $0x8] sm:$0xff]  }
  0x2a   :  { %804 = vmatprep.mubr.bf16.mxu0 %v865_v4  ;;  %820 = vmatprep.mubr.bf16.mxu1 %v866_v5  ;;  %v868_v11 = vld [vmem:[#allocation2 + $0x48] sm:$0xff]   ;;  %v869_v12 = vld [vmem:[#allocation2 + $0x10] sm:$0xff]   ;;  %v871_v14 = vld [vmem:[#allocation2 + $0x18] sm:$0xff]   ;;  %v96_v28 = vsub.s32 0, %v95_v25 }
  0x2b   :  { %v870_v13 = vld [vmem:[#allocation2 + $0x50] sm:$0xff]   ;;  %v872_v15 = vld [vmem:[#allocation2 + $0x58] sm:$0xff]   ;;  %v873_v16 = vld [vmem:[#allocation2 + $0x20] sm:$0xff]  }
  0x2c   :  { %791 = vmatpush3.bf16.msra.mxu0 %v858_v1  ;;  %845 = vmatpush3.bf16.msra.mxu1 %v858_v1  ;;  %v874_v17 = vld [vmem:[#allocation2 + $0x60] sm:$0xff]   ;;  %v875_v18 = vld [vmem:[#allocation2 + $0x28] sm:$0xff]   ;;  %v877_v20 = vld [vmem:[#allocation2 + $0x30] sm:$0xff]  }
  0x2d   :  { %792 = vmatprep.subr.bf16.mxu0 %v859_v2  ;;  %838 = vmatprep.subr.bf16.mxu1 %v859_v2  ;;  %v876_v19 = vld [vmem:[#allocation2 + $0x68] sm:$0xff]   ;;  %v878_v21 = vld [vmem:[#allocation2 + $0x70] sm:$0xff]   ;;  %v879_v22 = vld [vmem:[#allocation2 + $0x38] sm:$0xff]  }
  0x2e   :  { %v880_v23 = vld [vmem:[#allocation2 + $0x78] sm:$0xff]   ;;  %v92_v26 = vld [vmem:[%s1062_s2] sm:$0x1]  ;;  %s957_s2 = smov [#allocation7]  }
  0x2f   :  { %v93_v27 = vunpack.c.l.bf16 %v92_v26  ;;  %s568_s11 = sshll.u32 %s957_s2, 4  ;;  %s569_s11 = int_to_ptr.vmem [resolvable:$true] %s568_s11 }
  0x30   :  { %793 = vmatpush3.bf16.msra.mxu0 %v859_v2  ;;  %846 = vmatpush3.bf16.msra.mxu1 %v859_v2  ;;  %s925_s12 = scalar_lea.vmem %s569_s11, 2048  ;;  %p930_p3 = scmp.lt.s32.totalorder %s569_s11, %s569_s11 }
  0x31   :  { %794 = vmatprep.subr.bf16.mxu0 %v860_v3  ;;  %839 = vmatprep.subr.bf16.mxu1 %v860_v3  ;;  %v1011_v29 = vrot.slane %v93_v27, %v96_v28  ;;  %p926_p2 = scmp.ne.s32.totalorder %s569_s11, %s925_s12  ;;  %p931_p4 = scmp.lt.s32.totalorder %s925_s12, %s925_s12 }
  0x33   :  { %p932_p5 = por %p931_p4, %p930_p3 }
  0x34   :  { %795 = vmatpush3.bf16.msra.mxu0 %v860_v3  ;;  %847 = vmatpush3.bf16.msra.mxu1 %v860_v3 }
  0x35   :  { %796 = vmatprep.subr.bf16.mxu0 %v861_v6  ;;  %840 = vmatprep.subr.bf16.mxu1 %v861_v6  ;;  %p933_p6 = pnand %p932_p5, %p926_p2 }
  0x38   :  { %797 = vmatpush3.bf16.msra.mxu0 %v861_v6  ;;  %848 = vmatpush3.bf16.msra.mxu1 %v861_v6 }
  0x39   :  { %798 = vmatprep.subr.bf16.mxu0 %v862_v7  ;;  %841 = vmatprep.subr.bf16.mxu1 %v862_v7 }
  0x3c   :  { %799 = vmatpush3.bf16.msra.mxu0 %v862_v7  ;;  %849 = vmatpush3.bf16.msra.mxu1 %v862_v7 }
  0x3d   :  { %800 = vmatprep.subr.bf16.mxu0 %v863_v8  ;;  %842 = vmatprep.subr.bf16.mxu1 %v863_v8 }
  0x40   :  { %801 = vmatpush3.bf16.msra.mxu0 %v863_v8  ;;  %850 = vmatpush3.bf16.msra.mxu1 %v863_v8 }
  0x41   :  { %802 = vmatprep.subr.bf16.mxu0 %v864_v9  ;;  %843 = vmatprep.subr.bf16.mxu1 %v864_v9 }
  0x44   :  { %803 = vmatpush3.bf16.msra.mxu0 %v864_v9  ;;  %851 = vmatpush3.bf16.msra.mxu1 %v864_v9 }
  0x47   :  { %805 = vmatmul.mubr.bf16.vlgmr.msra.gmra.mrb[0].mxu0 %v867_v10  ;;  %821 = vmatmul.mubr.bf16.vlgmr.msra.gmra.mrb[0].mxu1 %v868_v11 }
  0x48   :  { %808 = vmatprep.mubr.bf16.mxu0 %v869_v12  ;;  %824 = vmatprep.mubr.bf16.mxu1 %v870_v13 }
  0x4f   :  { %809 = vmatmul.mubr.bf16.gmra.mrb[4].mxu0 %v871_v14  ;;  %825 = vmatmul.mubr.bf16.gmra.mrb[4].mxu1 %v872_v15 }
  0x50   :  { %812 = vmatprep.mubr.bf16.mxu0 %v873_v16  ;;  %828 = vmatprep.mubr.bf16.mxu1 %v874_v17 }
  0x57   :  { %813 = vmatmul.mubr.bf16.gmra.mrb[8].mxu0 %v875_v18  ;;  %829 = vmatmul.mubr.bf16.gmra.mrb[8].mxu1 %v876_v19 }
  0x58   :  { %816 = vmatprep.mubr.bf16.mxu0 %v877_v20  ;;  %832 = vmatprep.mubr.bf16.mxu1 %v878_v21 }
  0x5f   :  { %817 = vmatmul.mubr.bf16.gmra.mrb[12].mxu0 %v879_v22  ;;  %833 = vmatmul.mubr.bf16.gmra.mrb[12].mxu1 %v880_v23 }
 0x11a   :  { %v806_v30 = vpop.f32.mrb[0].mxu0  ;;  %v822_v31 = vpop.f32.mrb[0].mxu1 }
 0x11b   :  { %v276_v32 = vpop.f32.mrb[1].mxu0  ;;  %v340_v33 = vpop.f32.mrb[1].mxu1  ;;  %v285_v36 = vadd.f32 %v806_v30, %v1011_v29  ;;  %v349_v37 = vadd.f32 %v822_v31, %v1011_v29 }
 0x11c   :  { %v807_v34 = vpop.f32.mrb[2].mxu0  ;;  %v823_v35 = vpop.f32.mrb[2].mxu1  ;;  %v277_v42 = vadd.f32 %v276_v32, %v1011_v29  ;;  %v341_v43 = vadd.f32 %v340_v33, %v1011_v29 }
 0x11d   :  { %v288_v38 = vadd.f32 %v807_v34, %v1011_v29  ;;  %v352_v39 = vadd.f32 %v823_v35, %v1011_v29  ;;  %v279_v40 = vpop.f32.mrb[3].mxu0  ;;  %v343_v41 = vpop.f32.mrb[3].mxu1 }
 0x11e   :  { %v280_v44 = vadd.f32 %v279_v40, %v1011_v29  ;;  %v344_v45 = vadd.f32 %v343_v41, %v1011_v29 }
 0x11f   :  { %v677_v46 = vpack.c.bf16 %v288_v38, %v285_v36  ;;  %v717_v47 = vpack.c.bf16 %v352_v39, %v349_v37 }
 0x120   :  { %v672_v48 = vpack.c.bf16 %v280_v44, %v277_v42  ;;  %v712_v49 = vpack.c.bf16 %v344_v45, %v341_v43 }
 0x121   :  { %749 = vst [vmem:[#allocation7 + $0x8] sm:$0xff] %v677_v46   ;;  %757 = vst [vmem:[#allocation7 + $0x48] sm:$0xff] %v717_v47  }
 0x122   :  { %673 = vst [vmem:[#allocation7] sm:$0xff] %v672_v48   ;;  %756 = vst [vmem:[#allocation7 + $0x40] sm:$0xff] %v712_v49   ;;  %v810_v50 = vpop.f32.mrb[4].mxu0  ;;  %v826_v51 = vpop.f32.mrb[4].mxu1 }
 0x123   :  { %v292_v52 = vpop.f32.mrb[5].mxu0  ;;  %v356_v53 = vpop.f32.mrb[5].mxu1  ;;  %v301_v56 = vadd.f32 %v810_v50, %v1011_v29  ;;  %v365_v57 = vadd.f32 %v826_v51, %v1011_v29 }
 0x124   :  { %v811_v54 = vpop.f32.mrb[6].mxu0  ;;  %v827_v55 = vpop.f32.mrb[6].mxu1  ;;  %v293_v62 = vadd.f32 %v292_v52, %v1011_v29  ;;  %v357_v63 = vadd.f32 %v356_v53, %v1011_v29 }
 0x125   :  { %v304_v58 = vadd.f32 %v811_v54, %v1011_v29  ;;  %v368_v59 = vadd.f32 %v827_v55, %v1011_v29  ;;  %v295_v60 = vpop.f32.mrb[7].mxu0  ;;  %v359_v61 = vpop.f32.mrb[7].mxu1 }
 0x126   :  { %v296_v0 = vadd.f32 %v295_v60, %v1011_v29  ;;  %v360_v1 = vadd.f32 %v359_v61, %v1011_v29 }
 0x127   :  { %v687_v2 = vpack.c.bf16 %v304_v58, %v301_v56  ;;  %v727_v3 = vpack.c.bf16 %v368_v59, %v365_v57 }
 0x128   :  { %v682_v4 = vpack.c.bf16 %v296_v0, %v293_v62  ;;  %v722_v5 = vpack.c.bf16 %v360_v1, %v357_v63 }
 0x129   :  { %751 = vst [vmem:[#allocation7 + $0x18] sm:$0xff] %v687_v2   ;;  %759 = vst [vmem:[#allocation7 + $0x58] sm:$0xff] %v727_v3  }
 0x12a   :  { %750 = vst [vmem:[#allocation7 + $0x10] sm:$0xff] %v682_v4   ;;  %758 = vst [vmem:[#allocation7 + $0x50] sm:$0xff] %v722_v5   ;;  %v814_v6 = vpop.f32.mrb[8].mxu0  ;;  %v830_v7 = vpop.f32.mrb[8].mxu1 }
 0x12b   :  { %v308_v8 = vpop.f32.mrb[9].mxu0  ;;  %v372_v9 = vpop.f32.mrb[9].mxu1  ;;  %v317_v12 = vadd.f32 %v814_v6, %v1011_v29  ;;  %v381_v13 = vadd.f32 %v830_v7, %v1011_v29 }
 0x12c   :  { %v815_v10 = vpop.f32.mrb[10].mxu0  ;;  %v831_v11 = vpop.f32.mrb[10].mxu1  ;;  %v309_v18 = vadd.f32 %v308_v8, %v1011_v29  ;;  %v373_v19 = vadd.f32 %v372_v9, %v1011_v29 }
 0x12d   :  { %v320_v14 = vadd.f32 %v815_v10, %v1011_v29  ;;  %v384_v15 = vadd.f32 %v831_v11, %v1011_v29  ;;  %v311_v16 = vpop.f32.mrb[11].mxu0  ;;  %v375_v17 = vpop.f32.mrb[11].mxu1 }
 0x12e   :  { %v312_v20 = vadd.f32 %v311_v16, %v1011_v29  ;;  %v376_v21 = vadd.f32 %v375_v17, %v1011_v29 }
 0x12f   :  { %v697_v22 = vpack.c.bf16 %v320_v14, %v317_v12  ;;  %v737_v23 = vpack.c.bf16 %v384_v15, %v381_v13 }
 0x130   :  { %v692_v24 = vpack.c.bf16 %v312_v20, %v309_v18  ;;  %v732_v25 = vpack.c.bf16 %v376_v21, %v373_v19 }
 0x131   :  { %753 = vst [vmem:[#allocation7 + $0x28] sm:$0xff] %v697_v22   ;;  %761 = vst [vmem:[#allocation7 + $0x68] sm:$0xff] %v737_v23  }
 0x132   :  { %752 = vst [vmem:[#allocation7 + $0x20] sm:$0xff] %v692_v24   ;;  %760 = vst [vmem:[#allocation7 + $0x60] sm:$0xff] %v732_v25   ;;  %v818_v26 = vpop.f32.mrb[12].mxu0  ;;  %v834_v27 = vpop.f32.mrb[12].mxu1 }
 0x133   :  { %v324_v28 = vpop.f32.mrb[13].mxu0  ;;  %v388_v30 = vpop.f32.mrb[13].mxu1  ;;  %v333_v33 = vadd.f32 %v818_v26, %v1011_v29  ;;  %v397_v34 = vadd.f32 %v834_v27, %v1011_v29 }
 0x134   :  { %v819_v31 = vpop.f32.mrb[14].mxu0  ;;  %v835_v32 = vpop.f32.mrb[14].mxu1  ;;  %v325_v39 = vadd.f32 %v324_v28, %v1011_v29  ;;  %v389_v40 = vadd.f32 %v388_v30, %v1011_v29 }
 0x135   :  { %v336_v35 = vadd.f32 %v819_v31, %v1011_v29  ;;  %v400_v36 = vadd.f32 %v835_v32, %v1011_v29  ;;  %v327_v37 = vpop.f32.mrb[15].mxu0  ;;  %v391_v38 = vpop.f32.mrb[15].mxu1 }
 0x136   :  { %v328_v41 = vadd.f32 %v327_v37, %v1011_v29  ;;  %v392_v42 = vadd.f32 %v391_v38, %v1011_v29 }
 0x137   :  { %v707_v43 = vpack.c.bf16 %v336_v35, %v333_v33  ;;  %v747_v44 = vpack.c.bf16 %v400_v36, %v397_v34 }
 0x138   :  { %v702_v45 = vpack.c.bf16 %v328_v41, %v325_v39  ;;  %v742_v46 = vpack.c.bf16 %v392_v42, %v389_v40 }
 0x139   :  { %755 = vst [vmem:[#allocation7 + $0x38] sm:$0xff] %v707_v43   ;;  %763 = vst [vmem:[#allocation7 + $0x78] sm:$0xff] %v747_v44  }
 0x13a   :  { %754 = vst [vmem:[#allocation7 + $0x30] sm:$0xff] %v702_v45   ;;  %762 = vst [vmem:[#allocation7 + $0x70] sm:$0xff] %v742_v46  }
 0x13b   :  { %936 = shalt.err (!%p933_p6)
}
 0x13c   :  { %s937_s15 = scalar_lea.hbm %s1063_s3, 2048 }
 0x13d   :  { %p938_p7 = scmp.ne.s32.totalorder %s1063_s3, %s937_s15  ;;  %p941_p8 = scmp.lt.u32.totalorder %s937_s15, %s1063_s3 }
 0x13f   :  { %p943_p9 = pnand %p941_p8, %p938_p7 }
 0x141   :  { %946 = shalt.err (!%p943_p9)
}
 0x142   :  { %574 = dma.vmem_to_hbm [thread:$0]  %s569_s11, 2048, %s1063_s3, [#allocation4], %s954_s22, %s954_s22, %s955_s23  }
 0x143   :  { %951 = dma.done.wait [#allocation4], 2048  }
 0x144   :  { %952 = vsyncadd [#allocation4], 4294965248 }
 0x145   :  { %578 = vsyncpa [#allocation3], 1 }
 0x146   :  { %579 = vsyncpa [#allocation6], 1 }
 0x147   :  { %580 = vsyncpa [#allocation4], 1 }

</bundles_post_ra>
